<compile_context>
chip_gen: v7x
topology: tpu7x:2x2x1
jax: 0.10.0
libtpu: 0.0.40
codegen_flags: <defaults>
</compile_context>

<pallas_src>
import jax
import jax.numpy as jnp
from jax.experimental import pallas as pl
from jax.experimental.pallas import tpu as pltpu


def attention_kernel(hid_ref, enc_ref, wh_ref, we_ref, b_ref, v_ref, out_ref):
    # Per-grid-step view (TB batch elements):
    #   hid_ref: (TB, H)      enc_ref: (TB, S, 2H)
    #   wh_ref:  (H, H)       we_ref:  (2H, H)
    #   b_ref:   (1, H)       v_ref:   (1, H)
    #   out_ref: (TB, S)      <- lane-dense output (S on lanes)
    tb, s, two_h = enc_ref.shape
    h = hid_ref.shape[-1]

    hid = hid_ref[...]                                  # (TB, H)
    enc = enc_ref[...].reshape(tb * s, two_h)           # (TB*S, 2H): M = TB*S rows

    # energy = tanh([hid_rep, enc] @ W_attn^T + b)  -- concat fused into two matmuls
    hp = jnp.dot(hid, wh_ref[...], preferred_element_type=jnp.float32)   # (TB, H)
    ep = jnp.dot(enc, we_ref[...], preferred_element_type=jnp.float32)   # (TB*S, H)
    energy = jnp.tanh(ep.reshape(tb, s, h) + hp[:, None, :] + b_ref[...])  # (TB, S, H)

    # attention logits: energy . v  via VPU multiply + lane (XLU) reduce -> (TB, S)
    score = jnp.sum(energy * v_ref[...], axis=-1)        # (TB, S), lane-dense

    # softmax over the sequence axis (last / lane axis), exact normalization
    m = jnp.max(score, axis=-1, keepdims=True)           # (TB, 1)
    e = jnp.exp(score - m)                                # (TB, S)
    denom = jnp.sum(e, axis=-1, keepdims=True)            # (TB, 1)
    out_ref[...] = (e / denom).astype(out_ref.dtype)


def attention_forward(hidden, enc_out, attn_w, attn_b, v_w, *, block_b=None):
    """hidden: (B, H), enc_out: (B, S, 2H), attn_w: (H, 3H), attn_b: (H,), v_w: (1, H)."""
    B, H = hidden.shape
    _, S, twoH = enc_out.shape
    assert twoH == 2 * H and attn_w.shape == (H, 3 * H)

    # Batch elements per grid step.  Default: whole batch in one step for small B.
    if block_b is None:
        block_b = B
    assert B % block_b == 0
    # (8, 128) tiling rule for the second-to-last block dim of hidden / out.
    assert block_b == B or block_b % 8 == 0

    # Split and pre-transpose weights for the kernel (glue, plain JAX).
    wh_t = attn_w[:, :H].T                 # (H, H)   acts on the repeated `hidden`
    we_t = attn_w[:, H:].T                 # (2H, H)  acts on enc_out
    b2d = attn_b.reshape(1, H)             # (1, H)
    v_row = v_w.reshape(1, H)              # (1, H)   row form for VPU mul + lane reduce

    grid = (B // block_b,)
    out = pl.pallas_call(
        attention_kernel,
        out_shape=jax.ShapeDtypeStruct((B, S), jnp.float32),
        grid_spec=pltpu.PrefetchScalarGridSpec(
            num_scalar_prefetch=0,
            grid=grid,
            in_specs=[
                pl.BlockSpec((block_b, H), lambda b: (b, 0)),           # hidden
                pl.BlockSpec((block_b, S, twoH), lambda b: (b, 0, 0)),  # enc_out
                pl.BlockSpec((H, H), lambda b: (0, 0)),                 # W_hid^T
                pl.BlockSpec((twoH, H), lambda b: (0, 0)),              # W_enc^T
                pl.BlockSpec((1, H), lambda b: (0, 0)),                 # bias
                pl.BlockSpec((1, H), lambda b: (0, 0)),                 # v (row)
            ],
            out_specs=pl.BlockSpec((block_b, S), lambda b: (b, 0)),     # lane-dense (B, S)
        ),
        compiler_params=pltpu.CompilerParams(
            dimension_semantics=("parallel",),
        ),
    )(hidden, enc_out, wh_t, we_t, b2d, v_row)

    return out                             # (B, S), no post-kernel slice


def attention_reference(hidden, enc_out, attn_w, attn_b, v_w):
    """Pure-JAX mirror of the PyTorch forward, for verification."""
    S = enc_out.shape[1]
    hid_rep = jnp.repeat(hidden[:, None, :], S, axis=1)           # (B, S, H)
    x = jnp.concatenate([hid_rep, enc_out], axis=2)               # (B, S, 3H)
    energy = jnp.tanh(x @ attn_w.T + attn_b)                      # (B, S, H)
    score = (energy @ v_w.T)[..., 0]                              # (B, S)
    return jax.nn.softmax(score, axis=1)


if __name__ == "__main__":
    B, S, H = 2, 8, 32   # batch, source sequence length, hidden_dim

    key = jax.random.PRNGKey(0)
    k_hid, k_enc, k_w, k_b, k_v = jax.random.split(key, 5)

    hidden = jax.random.normal(k_hid, (B, H), dtype=jnp.float32)
    enc_out = jax.random.normal(k_enc, (B, S, 2 * H), dtype=jnp.float32)

    # Deterministic parameter init (shapes from nn.Linear(3H, H) and nn.Linear(H, 1, bias=False)).
    attn_w = jax.random.uniform(k_w, (H, 3 * H), minval=-0.1, maxval=0.1, dtype=jnp.float32)
    attn_b = jax.random.uniform(k_b, (H,), minval=-0.1, maxval=0.1, dtype=jnp.float32)
    v_w = jax.random.uniform(k_v, (1, H), minval=-0.1, maxval=0.1, dtype=jnp.float32)

    out = attention_forward(hidden, enc_out, attn_w, attn_b, v_w)
    out = jax.block_until_ready(out)

    ref = attention_reference(hidden, enc_out, attn_w, attn_b, v_w)
    assert out.shape == (B, S)
    assert jnp.allclose(out, ref, atol=1e-5, rtol=1e-5)
    assert jnp.allclose(jnp.sum(out, axis=1), jnp.ones((B,)), atol=1e-5)

    print("KERNEL_OK")
</pallas_src>

<mosaic_0001>
module attributes {stable_mosaic.version = 11 : i64} {
  func.func @attention_kernel(%arg0: i32, %arg1: memref<2x32xf32, #tpu.memory_space<vmem>>, %arg2: memref<2x8x64xf32, #tpu.memory_space<vmem>>, %arg3: memref<32x32xf32, #tpu.memory_space<vmem>>, %arg4: memref<64x32xf32, #tpu.memory_space<vmem>>, %arg5: memref<1x32xf32, #tpu.memory_space<vmem>>, %arg6: memref<1x32xf32, #tpu.memory_space<vmem>>, %arg7: memref<2x8xf32, #tpu.memory_space<vmem>>) attributes {dimension_semantics = [#tpu.dimension_semantics<parallel>], iteration_bounds = array<i64: 1>, scalar_prefetch = 0 : i64, scratch_operands = 0 : i64, tpu.core_type = #tpu.core_type<tc>, window_params = [{transform_indices = @transform_0, window_bounds = array<i64: 2, 32>}, {transform_indices = @transform_1, window_bounds = array<i64: 2, 8, 64>}, {pipeline_mode = #tpu.pipeline_mode<synchronous>, transform_indices = @transform_2, window_bounds = array<i64: 32, 32>}, {pipeline_mode = #tpu.pipeline_mode<synchronous>, transform_indices = @transform_3, window_bounds = array<i64: 64, 32>}, {pipeline_mode = #tpu.pipeline_mode<synchronous>, transform_indices = @transform_4, window_bounds = array<i64: 1, 32>}, {pipeline_mode = #tpu.pipeline_mode<synchronous>, transform_indices = @transform_5, window_bounds = array<i64: 1, 32>}, {transform_indices = @transform_6, window_bounds = array<i64: 2, 8>}]} {
    %c0 = arith.constant 0 : index
    %c0_0 = arith.constant 0 : index
    %0 = vector.load %arg1[%c0, %c0_0] : memref<2x32xf32, #tpu.memory_space<vmem>>, vector<2x32xf32>
    %c0_1 = arith.constant 0 : index
    %c0_2 = arith.constant 0 : index
    %c0_3 = arith.constant 0 : index
    %1 = vector.load %arg2[%c0_1, %c0_2, %c0_3] : memref<2x8x64xf32, #tpu.memory_space<vmem>>, vector<2x8x64xf32>
    %2 = vector.shape_cast %1 : vector<2x8x64xf32> to vector<16x64xf32>
    %c0_4 = arith.constant 0 : index
    %c0_5 = arith.constant 0 : index
    %3 = vector.load %arg3[%c0_4, %c0_5] : memref<32x32xf32, #tpu.memory_space<vmem>>, vector<32x32xf32>
    %cst = arith.constant dense<0.000000e+00> : vector<2x32xf32>
    %4 = tpu.matmul %0, %3, %cst {dimension_numbers = #tpu.dot_dimension_numbers<[1], [0], [0], [1], [0, 0, 1, 1], [], []>} : vector<2x32xf32>, vector<32x32xf32>, vector<2x32xf32> -> vector<2x32xf32>
    %c0_6 = arith.constant 0 : index
    %c0_7 = arith.constant 0 : index
    %5 = vector.load %arg4[%c0_6, %c0_7] : memref<64x32xf32, #tpu.memory_space<vmem>>, vector<64x32xf32>
    %cst_8 = arith.constant dense<0.000000e+00> : vector<16x32xf32>
    %6 = tpu.matmul %2, %5, %cst_8 {dimension_numbers = #tpu.dot_dimension_numbers<[1], [0], [0], [1], [0, 0, 1, 1], [], []>} : vector<16x64xf32>, vector<64x32xf32>, vector<16x32xf32> -> vector<16x32xf32>
    %7 = vector.shape_cast %6 : vector<16x32xf32> to vector<2x8x32xf32>
    %8 = vector.shape_cast %4 : vector<2x32xf32> to vector<2x1x32xf32>
    %9 = vector.broadcast %8 : vector<2x1x32xf32> to vector<2x8x32xf32>
    %10 = arith.addf %7, %9 : vector<2x8x32xf32>
    %c0_9 = arith.constant 0 : index
    %c0_10 = arith.constant 0 : index
    %11 = vector.load %arg5[%c0_9, %c0_10] : memref<1x32xf32, #tpu.memory_space<vmem>>, vector<1x32xf32>
    %12 = vector.shape_cast %11 : vector<1x32xf32> to vector<1x1x32xf32>
    %13 = vector.broadcast %12 : vector<1x1x32xf32> to vector<2x8x32xf32>
    %14 = arith.addf %10, %13 : vector<2x8x32xf32>
    %15 = math.tanh %14 : vector<2x8x32xf32>
    %c0_11 = arith.constant 0 : index
    %c0_12 = arith.constant 0 : index
    %16 = vector.load %arg6[%c0_11, %c0_12] : memref<1x32xf32, #tpu.memory_space<vmem>>, vector<1x32xf32>
    %17 = vector.shape_cast %16 : vector<1x32xf32> to vector<1x1x32xf32>
    %18 = vector.broadcast %17 : vector<1x1x32xf32> to vector<2x8x32xf32>
    %19 = arith.mulf %15, %18 : vector<2x8x32xf32>
    %cst_13 = arith.constant dense<0.000000e+00> : vector<2x8xf32>
    %20 = vector.multi_reduction <add>, %19, %cst_13 [2] : vector<2x8x32xf32> to vector<2x8xf32>
    %cst_14 = arith.constant dense<0xFF800000> : vector<2xf32>
    %21 = vector.multi_reduction <maximumf>, %20, %cst_14 [1] : vector<2x8xf32> to vector<2xf32>
    %22 = vector.shape_cast %21 : vector<2xf32> to vector<2x1xf32>
    %23 = vector.broadcast %22 : vector<2x1xf32> to vector<2x8xf32>
    %24 = arith.subf %20, %23 : vector<2x8xf32>
    %25 = math.exp %24 : vector<2x8xf32>
    %cst_15 = arith.constant dense<0.000000e+00> : vector<2xf32>
    %26 = vector.multi_reduction <add>, %25, %cst_15 [1] : vector<2x8xf32> to vector<2xf32>
    %27 = vector.shape_cast %26 : vector<2xf32> to vector<2x1xf32>
    %28 = vector.broadcast %27 : vector<2x1xf32> to vector<2x8xf32>
    %29 = arith.divf %25, %28 : vector<2x8xf32>
    %c0_16 = arith.constant 0 : index
    %c0_17 = arith.constant 0 : index
    %30 = vector.load %arg7[%c0_16, %c0_17] : memref<2x8xf32, #tpu.memory_space<vmem>>, vector<2x8xf32>
    tpu.vector_store %arg7[%c0_16, %c0_17], %29 {strides = array<i32>} : memref<2x8xf32, #tpu.memory_space<vmem>>, vector<2x8xf32>,
    return
  }
  func.func @transform_0(%arg0: i32) -> (i32, i32) {
    %c0_i32 = arith.constant 0 : i32
    %c0_i32_0 = arith.constant 0 : i32
    return %arg0, %c0_i32 : i32, i32
  }
  func.func @transform_1(%arg0: i32) -> (i32, i32, i32) {
    %c0_i32 = arith.constant 0 : i32
    %c0_i32_0 = arith.constant 0 : i32
    %c0_i32_1 = arith.constant 0 : i32
    return %arg0, %c0_i32, %c0_i32_0 : i32, i32, i32
  }
  func.func @transform_2(%arg0: i32) -> (i32, i32) {
    %c0_i32 = arith.constant 0 : i32
    %c0_i32_0 = arith.constant 0 : i32
    %c0_i32_1 = arith.constant 0 : i32
    return %c0_i32, %c0_i32_0 : i32, i32
  }
  func.func @transform_3(%arg0: i32) -> (i32, i32) {
    %c0_i32 = arith.constant 0 : i32
    %c0_i32_0 = arith.constant 0 : i32
    %c0_i32_1 = arith.constant 0 : i32
    return %c0_i32, %c0_i32_0 : i32, i32
  }
  func.func @transform_4(%arg0: i32) -> (i32, i32) {
    %c0_i32 = arith.constant 0 : i32
    %c0_i32_0 = arith.constant 0 : i32
    %c0_i32_1 = arith.constant 0 : i32
    return %c0_i32, %c0_i32_0 : i32, i32
  }
  func.func @transform_5(%arg0: i32) -> (i32, i32) {
    %c0_i32 = arith.constant 0 : i32
    %c0_i32_0 = arith.constant 0 : i32
    %c0_i32_1 = arith.constant 0 : i32
    return %c0_i32, %c0_i32_0 : i32, i32
  }
  func.func @transform_6(%arg0: i32) -> (i32, i32) {
    %c0_i32 = arith.constant 0 : i32
    %c0_i32_0 = arith.constant 0 : i32
    return %arg0, %c0_i32 : i32, i32
  }
}

</mosaic_0001>

<bundles_post_ra>
// kernel: tpu_custom_call.1
= control target key start
LH: loop header
LB: loop body
LE: loop exit
PB: predicated region body
PF: predicated region fallthrough
CT: control target
= control target key end

     0   :  { %v477_v3 = vmov 0.0|0.0   ;;  %vm478_vm0 = vmmov 0   ;;  %v479_v8 = vmov 0.0   ;;  %vm113_vm1 = vcmask 523264   ;;  %s598_s0 = inlined_call_operand.vmem [shape: f32[2,32], index: 0, kind: input, shape index: {}]   ;;  %s599_s1 = inlined_call_operand.vmem [shape: f32[2,8,64], index: 1, kind: input, shape index: {}]   ;;  %s600_s2 = inlined_call_operand.vmem [shape: f32[32,32], index: 2, kind: input, shape index: {}]   ;;  %s601_s3 = inlined_call_operand.vmem [shape: f32[64,32], index: 3, kind: input, shape index: {}]   ;;  %s602_s4 = inlined_call_operand.vmem [shape: f32[1,32], index: 4, kind: input, shape index: {}]   ;;  %s603_s5 = inlined_call_operand.vmem [shape: f32[1,32], index: 5, kind: input, shape index: {}]   ;;  %s604_s6 = inlined_call_operand.hbm [shape: f32[2,8], index: 6, kind: output, shape index: {}]  }
   0x1   :  { %v105_v0 = vld [vmem:[%s601_s3] sm:$0xff]  ;;  %v106_v1 = vld [vmem:[%s601_s3 + $0x8] sm:$0xff]  ;;  %411 = vmatprep.subr.bf16.mxu0 %v477_v3  ;;  %v107_v6 = vld [vmem:[%s601_s3 + $0x10] sm:$0xff]  ;;  %389 = vmatprep.mubr.msk.f32.mxu0 %vm478_vm0, %v479_v8 }
   0x2   :  { %v27_v2 = vld [vmem:[%s600_s2] sm:$0xff]  ;;  %v417_v4 = vpack.c.bf16 %v106_v1, %v105_v0  ;;  %v28_v5 = vld [vmem:[%s600_s2 + $0x8] sm:$0xff]  ;;  %v108_v7 = vld [vmem:[%s601_s3 + $0x18] sm:$0xff] }
   0x3   :  { %v412_v9 = vpack.c.bf16 %v28_v5, %v27_v2  ;;  %v421_v10 = vpack.c.bf16 %v108_v7, %v107_v6  ;;  %v29_v11 = vld [vmem:[%s600_s2 + $0x10] sm:$0xff]  ;;  %v30_v12 = vld [vmem:[%s600_s2 + $0x18] sm:$0xff]  ;;  %v109_v13 = vld [vmem:[%s601_s3 + $0x20] sm:$0xff] }
   0x4   :  { %418 = vmatprep.subr.bf16.mxu1 %v417_v4  ;;  %v110_v14 = vld [vmem:[%s601_s3 + $0x28] sm:$0xff]  ;;  %v415_v15 = vpack.c.bf16 %v30_v12, %v29_v11  ;;  %v25_v16 = vld [vmem:[%s599_s1] sm:$0xff] }
   0x5   :  { %413 = vmatpush3.bf16.msra.mxu0 %v412_v9  ;;  %420 = vmatpush3.bf16.msra.mxu1 %v417_v4  ;;  %v425_v17 = vpack.c.bf16 %v110_v14, %v109_v13 }
   0x6   :  { %414 = vmatprep.subr.bf16.mxu0 %v477_v3  ;;  %422 = vmatprep.subr.bf16.mxu1 %v421_v10 }
   0x7   :  { %11 = vsyncpa [#allocation3], 0  ;;  %v111_v18 = vld [vmem:[%s601_s3 + $0x30] sm:$0xff]  ;;  %v112_v19 = vld [vmem:[%s601_s3 + $0x38] sm:$0xff]  ;;  %408 = vmatprep.mubr.msk.f32.mxu1 %vm113_vm1, %v25_v16  ;;  %vm31_vm2 = vcmask 261120   ;;  %v199_v25 = vlaneseq  ;;  %vm268_vm3 = vcmask 1041409  }
   0x8   :  { %v24_v20 = vld [vmem:[%s598_s0] sm:$0x3]  ;;  %v429_v21 = vpack.c.bf16 %v112_v19, %v111_v18  ;;  %v26_v22 = vld [vmem:[%s599_s1 + $0x8] sm:$0xff]  ;;  %v480_v23 = vmov 1966171168   ;;  %vm271_vm4 = vcmask 58368  }
   0x9   :  { %416 = vmatpush3.bf16.msra.mxu0 %v415_v15  ;;  %424 = vmatpush3.bf16.msra.mxu1 %v421_v10  ;;  %v197_v24 = vunpack.c.l.s4 %v480_v23  ;;  %v566_v27 = vshrl.u32 %v199_v25, 7  ;;  %v364_v39 = vld [vmem:[%s602_s4] ss:$0 sm:$0xff]  ;;  %v259_v52 = vand.u32 127, %v199_v25  ;;  %v481_v60 = vmov 0   ;;  %s482_s4 = smov [#allocation2]  }
   0xa   :  { %426 = vmatprep.subr.bf16.mxu1 %v425_v17  ;;  %v365_v45 = vld [vmem:[%s603_s5] ss:$0 sm:$0xff]  ;;  %440 = vset.pattern.permute.xlu0 %v481_v60  ;;  %s353_s5 = sshll.u32 %s482_s4, 4  ;;  %s354_s5 = int_to_ptr.vmem [resolvable:$true] %s353_s5 }
   0xb   :  { %v198_v26 = vunpack.c.0.s8 %v197_v24  ;;  %v220_v32 = vsub.s32 0, %v566_v27  ;;  %v262_v54 = vsub.s32 %v259_v52, %v566_v27  ;;  %439 = vset.pattern.permute.xlu1 %v481_v60  ;;  %v282_v61 = vsub.s32 1, %v566_v27  ;;  %s453_s27 = scalar_lea.vmem %s354_s5, 32  ;;  %p458_p1 = scmp.lt.s32.totalorder %s354_s5, %s354_s5 }
   0xc   :  { %390 = vmatmul.mubr.msk.f32.vlgmr.msra.gmra.mrb[0].mxu0 %vm31_vm2, %v24_v20  ;;  %p454_p0 = scmp.ne.s32.totalorder %s354_s5, %s453_s27  ;;  %p459_p2 = scmp.lt.s32.totalorder %s453_s27, %s453_s27 }
   0xd   :  { %428 = vmatpush3.bf16.msra.mxu1 %v425_v17  ;;  %v201_v28 = vsub.s32 %v198_v26, %v566_v27 }
   0xe   :  { %430 = vmatprep.subr.bf16.mxu1 %v429_v21  ;;  %p460_p3 = por %p459_p2, %p458_p1 }
  0x10   :  { %p461_p4 = pnand %p460_p3, %p454_p0 }
  0x11   :  { %432 = vmatpush3.bf16.msra.mxu1 %v429_v21 }
  0x14   :  { %409 = vmatmul.mubr.msk.f32.vlgmr.msra.gmra.mrb[0].mxu1 %vm113_vm1, %v26_v22 }
  0xdf   :  { %v101_v29 = vpop.f32.mrb[0].mxu0 }
  0xe0   :  { %v202_v30 = vrot.slane %v101_v29, %v201_v28  ;;  %v391_v31 = vpop.f32.mrb[1].mxu0 }
  0xe2   :  { %v203_v33 = vcombine.high %v202_v30, %v202_v30  ;;  %v210_v34 = vrot.slane %v202_v30, %v201_v28 }
  0xe4   :  { %v217_v35 = vrot.slane %v203_v33, %v201_v28  ;;  %v221_v36 = vrot.slane %v210_v34, %v220_v32 }
  0xe6   :  { %v225_v37 = vrot.slane %v217_v35, %v220_v32 }
  0xe7   :  { %v410_v38 = vpop.f32.mrb[0].mxu1 }
  0xe8   :  { %v229_v40 = vadd.f32 %v410_v38, %v225_v37  ;;  %v186_v41 = vpop.f32.mrb[1].mxu1 }
  0xe9   :  { %v228_v42 = vadd.f32 %v221_v36, %v186_v41 }
  0xea   :  { %v238_v43 = vadd.f32 %v364_v39, %v229_v40 }
  0xeb   :  { %v237_v44 = vadd.f32 %v364_v39, %v228_v42 }
  0xec   :  { %441 = vtanh.f32 %v238_v43 }
  0xed   :  { %443 = vtanh.f32 %v237_v44 }
  0xf6   :  { %v442_v46 = vpop.eup %441 }
  0xf7   :  { %v444_v47 = vpop.eup %443  ;;  %v249_v50 = vmul.f32 %v442_v46, %v365_v45 }
  0xf8   :  { %v248_v48 = vmul.f32 %v444_v47, %v365_v45 }
  0xf9   :  { %v253_v51 = vsel %vm31_vm2, %v249_v50, 0.0 }
  0xfa   :  { %v250_v49 = vsel %vm31_vm2, %v248_v48, 0.0 }
  0xfb   :  { %251 = vadd.xlane.f32.xlu0 %v250_v49 }
  0xff   :  { %254 = vadd.xlane.f32.xlu0 %v253_v51 }
 0x188   :  { %v252_v53 = vpop.xlane.xlu0 %251 }
 0x189   :  { %v263_v56 = vrot.slane %v252_v53, %v262_v54 }
 0x18c   :  { %v255_v55 = vpop.xlane.xlu0 %254 }
 0x18d   :  { %v267_v57 = vrot.slane %v255_v55, %v262_v54 }
 0x18f   :  { %v269_v58 = vsel %vm268_vm3, %v267_v57, %v263_v56 }
 0x190   :  { %v272_v59 = vsel %vm271_vm4, %v269_v58, -inf }
 0x191   :  { %273 = vmax.xlane.f32.xlu1 %v272_v59 }
 0x21e   :  { %v274_v62 = vpop.xlane.xlu1 %273 }
 0x21f   :  { %v279_v63 = vrot.slane %v274_v62, %v220_v32  ;;  %v283_v0 = vrot.slane %v274_v62, %v282_v61 }
 0x221   :  { %v286_v1 = vsub.f32 %v252_v53, %v279_v63  ;;  %v287_v2 = vsub.f32 %v255_v55, %v283_v0 }
 0x223   :  { %v288_v3 = vmul.f32 1.442695, %v286_v1  ;;  %v290_v4 = vmul.f32 1.442695, %v287_v2 }
 0x225   :  { %445 = vpow2.f32 %v288_v3 }
 0x226   :  { %447 = vpow2.f32 %v290_v4 }
 0x22f   :  { %v446_v5 = vpop.eup %445 }
 0x230   :  { %v448_v6 = vpop.eup %447  ;;  %295 = vperm.xlu1 %439, %v446_v5  }
 0x231   :  { %298 = vperm.xlu0 %440, %v448_v6  }
 0x2af   :  { %v296_v7 = vpop.permute.xlu1 %295 }
 0x2b0   :  { %v299_v8 = vpop.permute.xlu0 %298  ;;  %v303_v9 = vrot.slane %v296_v7, %v262_v54 }
 0x2b1   :  { %v307_v10 = vrot.slane %v299_v8, %v262_v54 }
 0x2b3   :  { %v308_v11 = vsel %vm268_vm3, %v307_v10, %v303_v9 }
 0x2b4   :  { %v310_v12 = vsel %vm271_vm4, %v308_v11, 0.0 }
 0x2b5   :  { %311 = vadd.xlane.f32.xlu1 %v310_v12 }
 0x342   :  { %v312_v13 = vpop.xlane.xlu1 %311 }
 0x343   :  { %v317_v14 = vrot.slane %v312_v13, %v220_v32  ;;  %v321_v15 = vrot.slane %v312_v13, %v282_v61 }
 0x345   :  { %449 = vrcp.f32 %v317_v14 }
 0x346   :  { %451 = vrcp.f32 %v321_v15 }
 0x34f   :  { %v450_v16 = vpop.eup %449 }
 0x350   :  { %v325_v17 = vmul.f32 %v450_v16, %v446_v5  ;;  %v452_v18 = vpop.eup %451 }
 0x351   :  { %v327_v19 = vmul.f32 %v452_v18, %v448_v6 }
 0x352   :  { %331 = vperm.xlu0 %440, %v325_v17  }
 0x356   :  { %334 = vperm.xlu0 %440, %v327_v19  }
 0x3d1   :  { %v332_v20 = vpop.permute.xlu0 %331 }
 0x3d2   :  { %v339_v22 = vrot.slane %v332_v20, %v262_v54 }
 0x3d5   :  { %v335_v21 = vpop.permute.xlu0 %334 }
 0x3d6   :  { %v343_v23 = vrot.slane %v335_v21, %v262_v54 }
 0x3d8   :  { %v344_v24 = vsel %vm268_vm3, %v343_v23, %v339_v22 }
 0x3d9   :  { %346 = vst.msk [vmem:[#allocation2] sm:$0x3] %vm271_vm4, %v344_v24 }
 0x3da   :  { %464 = shalt.err (!%p461_p4)
}
 0x3db   :  { %s465_s30 = scalar_lea.hbm %s604_s6, 32 }
 0x3dc   :  { %p466_p5 = scmp.ne.s32.totalorder %s604_s6, %s465_s30  ;;  %p469_p6 = scmp.lt.u32.totalorder %s465_s30, %s604_s6 }
 0x3de   :  { %p471_p7 = pnand %p469_p6, %p466_p5 }
 0x3e0   :  { %474 = shalt.err (!%p471_p7)
}
 0x3e1   :  { %356 = dma.vmem_to_hbm [thread:$0]  %s354_s5, 32, %s604_s6, [#allocation3]  }
 0x3e2   :  { %475 = dma.done.wait [#allocation3], 32  }
 0x3e3   :  { %476 = vsyncadd [#allocation3], 4294967264 }
 0x3e4   :  { %360 = vsyncpa [#allocation3], 1 }

</bundles_post_ra>
